<compile_context>
chip_gen: v7x
topology: tpu7x:2x2x1
jax: 0.10.0
libtpu: 0.0.40
codegen_flags: <defaults>
</compile_context>

<pallas_src>
import jax
import jax.numpy as jnp
from jax.experimental import pallas as pl
from jax.experimental.pallas import tpu as pltpu


def _round_up(n: int, m: int) -> int:
    return ((n + m - 1) // m) * m


def _mlp_kernel(x_ref, w1_ref, b1_ref, w2t_ref, b2_ref, o_ref):
    # Per grid step:
    #   x:   (TB, 11)  batch tile (features on lanes)
    #   w1:  (8, 11)   fc1 weight, PyTorch (out, in) layout
    #   b1:  (8, 1)
    #   w2t: (8, 1)    fc2 weight transposed
    #   b2:  (1, 1)
    #   o:   (1, TB)   lane-dense output (batch on lanes)
    x = x_ref[...]

    # fc1, reoriented so the hidden state lands as (8, TB): contract the
    # feature dim (11) of both operands (same MXU pattern as q @ k.T).
    h = jax.lax.dot_general(
        w1_ref[...],
        x,
        dimension_numbers=(((1,), (1,)), ((), ())),
        preferred_element_type=jnp.float32,
    ) + b1_ref[...]                                   # (8, TB)

    h = jax.nn.sigmoid(h)                             # EUP on fully packed vregs

    # fc2 (K=8, N=1): VPU multiply + 8-deep sublane reduce; keeps the result
    # lane-dense instead of a wasted N=1 MXU matmul.
    out = jnp.sum(h * w2t_ref[...], axis=0, keepdims=True) + b2_ref[...]   # (1, TB)
    o_ref[...] = out.astype(o_ref.dtype)


def vehicle_price_identifier(x, w1, b1, w2, b2, *, tb=4096):
    """x: (B, 11) f32; w1: (8, 11); b1: (8,); w2: (1, 8); b2: (1,) -> (B, 1)."""
    B = x.shape[0]

    # Tile size: multiple of 128 (lane width), never bigger than padded B.
    tb_eff = min(tb, _round_up(B, 128))
    b_pad = _round_up(B, tb_eff)
    if b_pad != B:
        x = jnp.pad(x, ((0, b_pad - B), (0, 0)))

    x = x.astype(jnp.float32)
    w1_c = w1.astype(jnp.float32)                 # (8, 11)
    b1_c = b1.reshape(8, 1).astype(jnp.float32)   # (8, 1)
    w2_t = w2.T.astype(jnp.float32)               # (8, 1)
    b2_c = b2.reshape(1, 1).astype(jnp.float32)   # (1, 1)

    out_flat = pl.pallas_call(
        _mlp_kernel,
        out_shape=jax.ShapeDtypeStruct((1, b_pad), jnp.float32),
        grid=(b_pad // tb_eff,),
        in_specs=[
            pl.BlockSpec((tb_eff, 11), lambda i: (i, 0)),   # streamed batch tile
            pl.BlockSpec((8, 11), lambda i: (0, 0)),        # VMEM-resident weights
            pl.BlockSpec((8, 1), lambda i: (0, 0)),
            pl.BlockSpec((8, 1), lambda i: (0, 0)),
            pl.BlockSpec((1, 1), lambda i: (0, 0)),
        ],
        out_specs=pl.BlockSpec((1, tb_eff), lambda i: (0, i)),
        compiler_params=pltpu.CompilerParams(
            dimension_semantics=("parallel",),
        ),
    )(x, w1_c, b1_c, w2_t, b2_c)

    return out_flat[0, :B].reshape(B, 1)


def _init_params(key):
    # Deterministic synthetic init matching nn.Linear shapes:
    # fc1.weight (8, 11), fc1.bias (8,), fc2.weight (1, 8), fc2.bias (1,)
    k1, k2, k3, k4 = jax.random.split(key, 4)
    bound1 = 1.0 / jnp.sqrt(11.0)
    bound2 = 1.0 / jnp.sqrt(8.0)
    w1 = jax.random.uniform(k1, (8, 11), jnp.float32, -bound1, bound1)
    b1 = jax.random.uniform(k2, (8,), jnp.float32, -bound1, bound1)
    w2 = jax.random.uniform(k3, (1, 8), jnp.float32, -bound2, bound2)
    b2 = jax.random.uniform(k4, (1,), jnp.float32, -bound2, bound2)
    return w1, b1, w2, b2


def _reference(x, w1, b1, w2, b2):
    h = jax.nn.sigmoid(x @ w1.T + b1)
    return h @ w2.T + b2


if __name__ == "__main__":
    key = jax.random.PRNGKey(0)
    kx, kp = jax.random.split(key)

    B = 8
    x = jax.random.normal(kx, (B, 11), jnp.float32)
    w1, b1, w2, b2 = _init_params(kp)

    out = vehicle_price_identifier(x, w1, b1, w2, b2)
    out = jax.block_until_ready(out)

    ref = _reference(x, w1, b1, w2, b2)
    assert out.shape == (B, 1)
    # Slightly looser tolerance than bit-exact: the kernel computes fc2 exactly
    # in f32 on the VPU while the XLA reference uses default matmul precision.
    assert jnp.allclose(out, ref, atol=1e-4, rtol=1e-3), (
        float(jnp.max(jnp.abs(out - ref)))
    )

    print("KERNEL_OK")
</pallas_src>

<mosaic_0001>
module attributes {stable_mosaic.version = 11 : i64} {
  func.func @_mlp_kernel(%arg0: i32, %arg1: memref<128x11xf32, #tpu.memory_space<vmem>>, %arg2: memref<8x11xf32, #tpu.memory_space<vmem>>, %arg3: memref<8x1xf32, #tpu.memory_space<vmem>>, %arg4: memref<8x1xf32, #tpu.memory_space<vmem>>, %arg5: memref<1x1xf32, #tpu.memory_space<vmem>>, %arg6: memref<1x128xf32, #tpu.memory_space<vmem>>) attributes {dimension_semantics = [#tpu.dimension_semantics<parallel>], iteration_bounds = array<i64: 1>, scalar_prefetch = 0 : i64, scratch_operands = 0 : i64, tpu.core_type = #tpu.core_type<tc>, window_params = [{transform_indices = @transform_0, window_bounds = array<i64: 128, 11>}, {pipeline_mode = #tpu.pipeline_mode<synchronous>, transform_indices = @transform_1, window_bounds = array<i64: 8, 11>}, {pipeline_mode = #tpu.pipeline_mode<synchronous>, transform_indices = @transform_2, window_bounds = array<i64: 8, 1>}, {pipeline_mode = #tpu.pipeline_mode<synchronous>, transform_indices = @transform_3, window_bounds = array<i64: 8, 1>}, {pipeline_mode = #tpu.pipeline_mode<synchronous>, transform_indices = @transform_4, window_bounds = array<i64: 1, 1>}, {transform_indices = @transform_5, window_bounds = array<i64: 1, 128>}]} {
    %c0 = arith.constant 0 : index
    %c0_0 = arith.constant 0 : index
    %0 = vector.load %arg1[%c0, %c0_0] : memref<128x11xf32, #tpu.memory_space<vmem>>, vector<128x11xf32>
    %c0_1 = arith.constant 0 : index
    %c0_2 = arith.constant 0 : index
    %1 = vector.load %arg2[%c0_1, %c0_2] : memref<8x11xf32, #tpu.memory_space<vmem>>, vector<8x11xf32>
    %cst = arith.constant dense<0.000000e+00> : vector<8x128xf32>
    %2 = tpu.matmul %1, %0, %cst {dimension_numbers = #tpu.dot_dimension_numbers<[1], [1], [0], [0], [0, 0, 1, 0], [], []>} : vector<8x11xf32>, vector<128x11xf32>, vector<8x128xf32> -> vector<8x128xf32>
    %c0_3 = arith.constant 0 : index
    %c0_4 = arith.constant 0 : index
    %3 = vector.load %arg3[%c0_3, %c0_4] : memref<8x1xf32, #tpu.memory_space<vmem>>, vector<8x1xf32>
    %4 = vector.broadcast %3 : vector<8x1xf32> to vector<8x128xf32>
    %5 = arith.addf %2, %4 : vector<8x128xf32>
    %6 = arith.negf %5 : vector<8x128xf32>
    %7 = math.exp %6 : vector<8x128xf32>
    %cst_5 = arith.constant 1.000000e+00 : f32
    %8 = vector.broadcast %cst_5 : f32 to vector<8x128xf32>
    %9 = arith.addf %8, %7 : vector<8x128xf32>
    %10 = arith.divf %8, %9 : vector<8x128xf32>
    %c0_6 = arith.constant 0 : index
    %c0_7 = arith.constant 0 : index
    %11 = vector.load %arg4[%c0_6, %c0_7] : memref<8x1xf32, #tpu.memory_space<vmem>>, vector<8x1xf32>
    %12 = vector.broadcast %11 : vector<8x1xf32> to vector<8x128xf32>
    %13 = arith.mulf %10, %12 : vector<8x128xf32>
    %cst_8 = arith.constant dense<0.000000e+00> : vector<128xf32>
    %14 = vector.multi_reduction <add>, %13, %cst_8 [0] : vector<8x128xf32> to vector<128xf32>
    %15 = vector.shape_cast %14 : vector<128xf32> to vector<1x128xf32>
    %c0_9 = arith.constant 0 : index
    %c0_10 = arith.constant 0 : index
    %16 = vector.load %arg5[%c0_9, %c0_10] : memref<1x1xf32, #tpu.memory_space<vmem>>, vector<1x1xf32>
    %17 = vector.broadcast %16 : vector<1x1xf32> to vector<1x128xf32>
    %18 = arith.addf %15, %17 : vector<1x128xf32>
    %c0_11 = arith.constant 0 : index
    %c0_12 = arith.constant 0 : index
    %19 = vector.load %arg6[%c0_11, %c0_12] : memref<1x128xf32, #tpu.memory_space<vmem>>, vector<1x128xf32>
    tpu.vector_store %arg6[%c0_11, %c0_12], %18 {strides = array<i32>} : memref<1x128xf32, #tpu.memory_space<vmem>>, vector<1x128xf32>,
    return
  }
  func.func @transform_0(%arg0: i32) -> (i32, i32) {
    %c0_i32 = arith.constant 0 : i32
    %c0_i32_0 = arith.constant 0 : i32
    return %arg0, %c0_i32 : i32, i32
  }
  func.func @transform_1(%arg0: i32) -> (i32, i32) {
    %c0_i32 = arith.constant 0 : i32
    %c0_i32_0 = arith.constant 0 : i32
    %c0_i32_1 = arith.constant 0 : i32
    return %c0_i32, %c0_i32_0 : i32, i32
  }
  func.func @transform_2(%arg0: i32) -> (i32, i32) {
    %c0_i32 = arith.constant 0 : i32
    %c0_i32_0 = arith.constant 0 : i32
    %c0_i32_1 = arith.constant 0 : i32
    return %c0_i32, %c0_i32_0 : i32, i32
  }
  func.func @transform_3(%arg0: i32) -> (i32, i32) {
    %c0_i32 = arith.constant 0 : i32
    %c0_i32_0 = arith.constant 0 : i32
    %c0_i32_1 = arith.constant 0 : i32
    return %c0_i32, %c0_i32_0 : i32, i32
  }
  func.func @transform_4(%arg0: i32) -> (i32, i32) {
    %c0_i32 = arith.constant 0 : i32
    %c0_i32_0 = arith.constant 0 : i32
    %c0_i32_1 = arith.constant 0 : i32
    return %c0_i32, %c0_i32_0 : i32, i32
  }
  func.func @transform_5(%arg0: i32) -> (i32, i32) {
    %c0_i32 = arith.constant 0 : i32
    %c0_i32_0 = arith.constant 0 : i32
    return %c0_i32, %arg0 : i32, i32
  }
}

</mosaic_0001>

<bundles_post_ra>
// kernel: tpu_custom_call.1
= control target key start
LH: loop header
LB: loop body
LE: loop exit
PB: predicated region body
PF: predicated region fallthrough
CT: control target
= control target key end

     0   :  { %s480_s0 = inlined_call_operand.vmem [shape: f32[128,11], index: 0, kind: input, shape index: {}]   ;;  %s481_s1 = inlined_call_operand.vmem [shape: f32[8,11], index: 1, kind: input, shape index: {}]   ;;  %s482_s2 = inlined_call_operand.vmem [shape: f32[8,1], index: 2, kind: input, shape index: {}]   ;;  %s483_s3 = inlined_call_operand.vmem [shape: f32[8,1], index: 3, kind: input, shape index: {}]   ;;  %s484_s4 = inlined_call_operand.<no memory space> [shape: f32[1,1], index: 4, kind: input, shape index: {}]   ;;  %s485_s5 = inlined_call_operand.hbm [shape: f32[1,128], index: 5, kind: output, shape index: {}]  }
   0x1   :  { %v10_v0 = vstv %s484_s4 }
   0x2   :  { %11 = vst [vmem:[#allocation2] sm:$0x1] %v10_v0 }
   0x3   :  { %v23_v1 = vld [vmem:[%s480_s0] sm:$0xff]  ;;  %v24_v2 = vld [vmem:[%s480_s0 + $0x8] sm:$0xff]  ;;  %vm46_vm0 = vcmask 89088   ;;  %v350_v3 = vmov 0.0|0.0   ;;  %vm351_vm2 = vmmov 0   ;;  %v352_v6 = vmov 0.0  }
   0x4   :  { %283 = vmatprep.subr.bf16.mxu0 %v350_v3  ;;  %v284_v4 = vpack.c.bf16 %v24_v2, %v23_v1  ;;  %vm396_vm1 = vmpackc.low %vm46_vm0, %vm46_vm0  ;;  %280 = vmatprep.mubr.msk.f32.mxu0 %vm351_vm2, %v352_v6  ;;  %v353_v7 = vmov 0   ;;  %v25_v8 = vld [vmem:[%s480_s0 + $0x10] sm:$0xff]  ;;  %v26_v9 = vld [vmem:[%s480_s0 + $0x18] sm:$0xff] }
   0x5   :  { %320 = vset.pattern.permute.xlu0 %v353_v7  ;;  %321 = vset.pattern.permute.xlu1 %v353_v7  ;;  %v40_v10 = vld [vmem:[%s482_s2] sm:$0xff]  ;;  %v288_v12 = vpack.c.bf16 %v26_v9, %v25_v8 }
   0x6   :  { %286 = vmatpush3.bf16.xpose.msk.msra.mxu0 %vm396_vm1, %v284_v4  ;;  %43 = vperm.xlu0 %320, %v40_v10  }
   0x7   :  { %287 = vmatprep.subr.bf16.mxu0 %v350_v3 }
   0x9   :  { %v187_v11 = vld [vmem:[#allocation2] sm:$0x1] }
   0xa   :  { %190 = vperm.xlu1 %321, %v187_v11  }
   0xb   :  { %12 = vsyncpa [#allocation4], 0  ;;  %v174_v13 = vld [vmem:[%s483_s3] sm:$0xff]  ;;  %v28_v15 = vld [vmem:[%s480_s0 + $0x28] sm:$0xff]  ;;  %v193_v40 = vlaneseq }
   0xc   :  { %177 = vperm.xlu0 %320, %v174_v13   ;;  %v27_v14 = vld [vmem:[%s480_s0 + $0x20] sm:$0xff]  ;;  %v29_v17 = vld [vmem:[%s480_s0 + $0x30] sm:$0xff]  ;;  %v30_v18 = vld [vmem:[%s480_s0 + $0x38] sm:$0xff] }
   0xd   :  { %v292_v16 = vpack.c.bf16 %v28_v15, %v27_v14  ;;  %v296_v19 = vpack.c.bf16 %v30_v18, %v29_v17  ;;  %v31_v20 = vld [vmem:[%s480_s0 + $0x40] sm:$0xff]  ;;  %v32_v21 = vld [vmem:[%s480_s0 + $0x48] sm:$0xff]  ;;  %v33_v23 = vld [vmem:[%s480_s0 + $0x50] sm:$0xff]  ;;  %v194_v44 = vshrl.u32 %v193_v40, 7 }
   0xe   :  { %290 = vmatpush3.bf16.xpose.msk.msra.mxu0 %vm396_vm1, %v288_v12  ;;  %v300_v22 = vpack.c.bf16 %v32_v21, %v31_v20  ;;  %v34_v24 = vld [vmem:[%s480_s0 + $0x58] sm:$0xff]  ;;  %v35_v26 = vld [vmem:[%s480_s0 + $0x60] sm:$0xff]  ;;  %v36_v27 = vld [vmem:[%s480_s0 + $0x68] sm:$0xff] }
   0xf   :  { %291 = vmatprep.subr.bf16.mxu0 %v350_v3  ;;  %v304_v25 = vpack.c.bf16 %v34_v24, %v33_v23  ;;  %v308_v28 = vpack.c.bf16 %v36_v27, %v35_v26  ;;  %v37_v29 = vld [vmem:[%s480_s0 + $0x70] sm:$0xff]  ;;  %v38_v30 = vld [vmem:[%s480_s0 + $0x78] sm:$0xff]  ;;  %v39_v32 = vld [vmem:[%s481_s1] sm:$0xff]  ;;  %v195_v47 = vsub.s32 0, %v194_v44  ;;  %s354_s0 = smov [#allocation3]  }
  0x10   :  { %v312_v31 = vpack.c.bf16 %v38_v30, %v37_v29  ;;  %s205_s1 = sshll.u32 %s354_s0, 4  ;;  %s206_s1 = int_to_ptr.vmem [resolvable:$true] %s205_s1 }
  0x11   :  { %s326_s29 = scalar_lea.vmem %s206_s1, 16  ;;  %s330_s30 = scalar_lea.vmem %s206_s1, 32 }
  0x12   :  { %p327_p0 = scmp.ne.s32.totalorder %s206_s1, %s326_s29  ;;  %p331_p1 = scmp.lt.s32.totalorder %s206_s1, %s206_s1 }
  0x13   :  { %p332_p2 = scmp.lt.s32.totalorder %s330_s30, %s326_s29 }
  0x15   :  { %p333_p3 = por %p332_p2, %p331_p1 }
  0x16   :  { %294 = vmatpush3.bf16.xpose.msk.msra.mxu0 %vm396_vm1, %v292_v16 }
  0x17   :  { %295 = vmatprep.subr.bf16.mxu0 %v350_v3  ;;  %p334_p4 = pnand %p333_p3, %p327_p0 }
  0x1e   :  { %298 = vmatpush3.bf16.xpose.msk.msra.mxu0 %vm396_vm1, %v296_v19 }
  0x1f   :  { %299 = vmatprep.subr.bf16.mxu0 %v350_v3 }
  0x26   :  { %302 = vmatpush3.bf16.xpose.msk.msra.mxu0 %vm396_vm1, %v300_v22 }
  0x27   :  { %303 = vmatprep.subr.bf16.mxu0 %v350_v3 }
  0x2e   :  { %306 = vmatpush3.bf16.xpose.msk.msra.mxu0 %vm396_vm1, %v304_v25 }
  0x2f   :  { %307 = vmatprep.subr.bf16.mxu0 %v350_v3 }
  0x36   :  { %310 = vmatpush3.bf16.xpose.msk.msra.mxu0 %vm396_vm1, %v308_v28 }
  0x37   :  { %311 = vmatprep.subr.bf16.mxu0 %v350_v3 }
  0x3e   :  { %314 = vmatpush3.bf16.xpose.msk.msra.mxu0 %vm396_vm1, %v312_v31 }
  0x45   :  { %281 = vmatmul.mubr.msk.f32.vlgmr.msra.gmra.mrb[0].mxu0 %vm46_vm0, %v39_v32 }
  0x85   :  { %v44_v33 = vpop.permute.xlu0 %43 }
  0x89   :  { %v191_v49 = vpop.permute.xlu1 %190 }
  0x8a   :  { %v196_v51 = vrot.slane %v191_v49, %v195_v47 }
  0x8b   :  { %v178_v42 = vpop.permute.xlu0 %177 }
 0x118   :  { %v164_v34 = vpop.f32.mrb[0].mxu0 }
 0x119   :  { %v165_v35 = vadd.f32 %v164_v34, %v44_v33  ;;  %v282_v36 = vpop.f32.mrb[1].mxu0 }
 0x11b   :  { %v230_v37 = vmul.f32 -1.442695, %v165_v35 }
 0x11d   :  { %322 = vpow2.f32 %v230_v37 }
 0x127   :  { %v323_v38 = vpop.eup %322 }
 0x128   :  { %v171_v39 = vadd.f32 1.0, %v323_v38 }
 0x12a   :  { %324 = vrcp.f32 %v171_v39 }
 0x134   :  { %v325_v41 = vpop.eup %324 }
 0x135   :  { %v180_v43 = vmul.f32 %v325_v41, %v178_v42 }
 0x137   :  { %v181_v45 = vrot.slane %v180_v43, 4 }
 0x139   :  { %v182_v46 = vadd.f32 %v181_v45, %v180_v43 }
 0x13b   :  { %v183_v48 = vrot.slane %v182_v46, 2 }
 0x13d   :  { %v184_v50 = vadd.f32 %v183_v48, %v182_v46 }
 0x13f   :  { %v185_v52 = vrot.slane %v184_v50, 1 }
 0x141   :  { %v186_v53 = vadd.f32 %v185_v52, %v184_v50 }
 0x143   :  { %v197_v54 = vadd.f32 %v196_v51, %v186_v53 }
 0x145   :  { %198 = vst [vmem:[#allocation3] sm:$0x1] %v197_v54 }
 0x146   :  { %337 = shalt.err (!%p334_p4)
}
 0x147   :  { %s338_s8 = scalar_lea.hbm %s485_s5, 16 }
 0x148   :  { %p339_p5 = scmp.ne.s32.totalorder %s485_s5, %s338_s8  ;;  %p342_p6 = scmp.lt.u32.totalorder %s338_s8, %s485_s5 }
 0x14a   :  { %p344_p7 = pnand %p342_p6, %p339_p5 }
 0x14c   :  { %347 = shalt.err (!%p344_p7)
}
 0x14d   :  { %208 = dma.vmem_to_hbm [thread:$0]  %s206_s1, 16, %s485_s5, [#allocation4]  }
 0x14e   :  { %348 = dma.done.wait [#allocation4], 16  }
 0x14f   :  { %349 = vsyncadd [#allocation4], 4294967280 }
 0x150   :  { %212 = vsyncpa [#allocation4], 1 }

</bundles_post_ra>
